<compile_context>
chip_gen: v7x
topology: tpu7x:2x2x1
jax: 0.10.0
libtpu: 0.0.40
codegen_flags: <defaults>
</compile_context>

<pallas_src>
import functools

import jax
import jax.numpy as jnp
from jax.experimental import pallas as pl
from jax.experimental.pallas import tpu as pltpu


def _disc_kernel(xt_ref, w1_ref, b1_ref, w2_ref, b2_ref, w3_ref, b3_ref, o_ref):
    """Fused 3-layer MLP forward for one batch tile (batch on the lane axis).

    xt_ref: [D_in, TB]            (VMEM, blocked over the grid)
    w1_ref: [H, D_in], b1_ref: [H, 1]     (VMEM residents)
    w2_ref: [H, H],    b2_ref: [H, 1]     (VMEM residents)
    w3_ref: [H, 1]                        (VMEM resident)
    b3_ref: [1, 1]                        (SMEM scalar)
    o_ref:  [1, TB]                       (lane-dense output)
    """
    x = xt_ref[...].astype(jnp.float32)  # mirrors `input.float()` in PyTorch

    h1 = jnp.tanh(
        jnp.dot(w1_ref[...], x, preferred_element_type=jnp.float32) + b1_ref[...]
    )
    h2 = jnp.tanh(
        jnp.dot(w2_ref[...], h1, preferred_element_type=jnp.float32) + b2_ref[...]
    )
    # Final 32 -> 1 layer as VPU multiply + sublane reduce (keeps MXU / vext
    # slots free and the store lane-dense).
    logits = jnp.sum(h2 * w3_ref[...], axis=0, keepdims=True) + b3_ref[0, 0]
    o_ref[...] = logits


def _choose_tiling(batch, batch_tile):
    """Pick a 128-aligned batch tile; prefer >=2 grid steps (v7x megacore)."""
    lane = 128
    b_pad = max(lane, -(-batch // lane) * lane)
    tb = min(batch_tile, b_pad)
    tb = max(lane, (tb // lane) * lane)
    if b_pad // tb < 2 and b_pad >= 2 * lane:
        tb = max(lane, (b_pad // (2 * lane)) * lane)
    b_pad = -(-b_pad // tb) * tb
    return b_pad, tb


@functools.partial(jax.jit, static_argnames=("batch_tile",))
def discriminator_forward(x, params, *, batch_tile=1024):
    """Runs the Discriminator forward pass via a single Pallas kernel.

    x: [B, state_shape + 1] float array (cast to f32 inside the kernel).
    params: dict with PyTorch-layout weights:
        w1 [H, D_in], b1 [H, 1], w2 [H, H], b2 [H, 1], w3 [H, 1], b3 [1, 1].
    Returns logits of shape [B, 1], float32 (same as `self.main(input.float())`).
    """
    B, D_in = x.shape
    H = params["w1"].shape[0]

    B_pad, tb = _choose_tiling(B, batch_tile)
    grid = (B_pad // tb,)

    x_pad = jnp.pad(x, ((0, B_pad - B), (0, 0))) if B_pad != B else x
    xt = x_pad.T  # [D_in, B_pad] -- layout plumbing, not compute hoisting.

    flops = 2 * B_pad * (D_in * H + H * H + H)
    transcendentals = 2 * B_pad * H
    bytes_accessed = (
        B_pad * D_in * xt.dtype.itemsize      # input
        + B_pad * 4                           # output
        + 4 * (H * D_in + H + H * H + H + H + 1)  # weights / biases
    )

    resident = pl.BlockSpec(memory_space=pltpu.MemorySpace.VMEM)

    out = pl.pallas_call(
        _disc_kernel,
        out_shape=jax.ShapeDtypeStruct((1, B_pad), jnp.float32),
        grid_spec=pltpu.PrefetchScalarGridSpec(
            num_scalar_prefetch=0,
            grid=grid,
            in_specs=[
                pl.BlockSpec((D_in, tb), lambda i: (0, i)),            # x^T tile
                resident,                                              # w1
                resident,                                              # b1
                resident,                                              # w2
                resident,                                              # b2
                resident,                                              # w3
                pl.BlockSpec(memory_space=pltpu.MemorySpace.SMEM),     # b3 scalar
            ],
            out_specs=pl.BlockSpec((1, tb), lambda i: (0, i)),
        ),
        compiler_params=pltpu.CompilerParams(
            dimension_semantics=("parallel",),
        ),
        cost_estimate=pl.CostEstimate(
            flops=flops,
            transcendentals=transcendentals,
            bytes_accessed=bytes_accessed,
        ),
    )(xt, params["w1"], params["b1"], params["w2"], params["b2"],
      params["w3"], params["b3"])

    return out[0, :B].reshape(B, 1)


def init_discriminator_params(key, state_shape, hidden_shape=32):
    """Deterministic init matching the PyTorch module's shapes.

    Weights are stored in PyTorch nn.Linear layout [out, in] (the kernel
    computes W @ x^T); biases are stored as columns [out, 1]; the last-layer
    weight is stored as [H, 1] (transpose of PyTorch's [1, H]) so it
    broadcasts directly against [H, TB].  Init is U(-1/sqrt(in), 1/sqrt(in))
    like PyTorch's default Linear init.
    """
    input_shape = state_shape + 1
    ks = jax.random.split(key, 6)

    def uniform(k, shape, fan_in):
        bound = 1.0 / float(fan_in) ** 0.5
        return jax.random.uniform(k, shape, jnp.float32, -bound, bound)

    return {
        "w1": uniform(ks[0], (hidden_shape, input_shape), input_shape),
        "b1": uniform(ks[1], (hidden_shape, 1), input_shape),
        "w2": uniform(ks[2], (hidden_shape, hidden_shape), hidden_shape),
        "b2": uniform(ks[3], (hidden_shape, 1), hidden_shape),
        "w3": uniform(ks[4], (hidden_shape, 1), hidden_shape),
        "b3": uniform(ks[5], (1, 1), hidden_shape),
    }


def discriminator_forward_ref(x, params):
    """Pure-JAX reference for correctness checking."""
    x = x.astype(jnp.float32)
    h1 = jnp.tanh(x @ params["w1"].T + params["b1"][:, 0])
    h2 = jnp.tanh(h1 @ params["w2"].T + params["b2"][:, 0])
    return h2 @ params["w3"] + params["b3"][0]


if __name__ == "__main__":
    # Small shapes consistent with the module: state_shape=7 -> input dim 8,
    # hidden=32, batch=8.
    state_shape = 7
    hidden_shape = 32
    batch = 8

    key = jax.random.PRNGKey(0)
    pkey, xkey, xkey2 = jax.random.split(key, 3)

    params = init_discriminator_params(pkey, state_shape, hidden_shape)
    # Input = concatenated (state, action), shape [B, state_shape + 1].
    x = jax.random.normal(xkey, (batch, state_shape + 1), dtype=jnp.float32)

    out = jax.block_until_ready(discriminator_forward(x, params))
    ref = discriminator_forward_ref(x, params)
    assert out.shape == (batch, 1), out.shape
    assert jnp.allclose(out, ref, atol=1e-4, rtol=1e-4), (
        f"mismatch: max err {jnp.max(jnp.abs(out - ref))}"
    )

    # Non-divisible batch to exercise padding + multi-step (megacore) tiling.
    x2 = jax.random.normal(xkey2, (300, state_shape + 1), dtype=jnp.float32)
    out2 = jax.block_until_ready(discriminator_forward(x2, params))
    ref2 = discriminator_forward_ref(x2, params)
    assert out2.shape == (300, 1), out2.shape
    assert jnp.allclose(out2, ref2, atol=1e-4, rtol=1e-4), (
        f"mismatch: max err {jnp.max(jnp.abs(out2 - ref2))}"
    )

    # TODO(synk): the PyTorch `train()` method (BCEWithLogitsLoss + Adam step)
    # is training-loop glue, not part of the forward hot path, and is not
    # implemented as a kernel.
    print("KERNEL_OK")
</pallas_src>

<mosaic_0001>
module attributes {stable_mosaic.version = 11 : i64} {
  func.func @_disc_kernel(%arg0: i32, %arg1: memref<8x128xf32, #tpu.memory_space<vmem>>, %arg2: memref<32x8xf32, #tpu.memory_space<vmem>>, %arg3: memref<32x1xf32, #tpu.memory_space<vmem>>, %arg4: memref<32x32xf32, #tpu.memory_space<vmem>>, %arg5: memref<32x1xf32, #tpu.memory_space<vmem>>, %arg6: memref<32x1xf32, #tpu.memory_space<vmem>>, %arg7: memref<1x1xf32, #tpu.memory_space<smem>>, %arg8: memref<1x128xf32, #tpu.memory_space<vmem>>) attributes {dimension_semantics = [#tpu.dimension_semantics<parallel>], iteration_bounds = array<i64: 1>, scalar_prefetch = 0 : i64, scratch_operands = 0 : i64, tpu.core_type = #tpu.core_type<tc>, window_params = [{transform_indices = @transform_0, window_bounds = array<i64: 8, 128>}, {pipeline_mode = #tpu.pipeline_mode<synchronous>, transform_indices = @transform_1, window_bounds = array<i64: 32, 8>}, {pipeline_mode = #tpu.pipeline_mode<synchronous>, transform_indices = @transform_2, window_bounds = array<i64: 32, 1>}, {pipeline_mode = #tpu.pipeline_mode<synchronous>, transform_indices = @transform_3, window_bounds = array<i64: 32, 32>}, {pipeline_mode = #tpu.pipeline_mode<synchronous>, transform_indices = @transform_4, window_bounds = array<i64: 32, 1>}, {pipeline_mode = #tpu.pipeline_mode<synchronous>, transform_indices = @transform_5, window_bounds = array<i64: 32, 1>}, {transform_indices = @transform_6, window_bounds = array<i64: 1, 1>}, {transform_indices = @transform_7, window_bounds = array<i64: 1, 128>}]} {
    %c0 = arith.constant 0 : index
    %c0_0 = arith.constant 0 : index
    %0 = vector.load %arg1[%c0, %c0_0] : memref<8x128xf32, #tpu.memory_space<vmem>>, vector<8x128xf32>
    %c0_1 = arith.constant 0 : index
    %c0_2 = arith.constant 0 : index
    %1 = vector.load %arg2[%c0_1, %c0_2] : memref<32x8xf32, #tpu.memory_space<vmem>>, vector<32x8xf32>
    %cst = arith.constant dense<0.000000e+00> : vector<32x128xf32>
    %2 = tpu.matmul %1, %0, %cst {dimension_numbers = #tpu.dot_dimension_numbers<[1], [0], [0], [1], [0, 0, 1, 1], [], []>} : vector<32x8xf32>, vector<8x128xf32>, vector<32x128xf32> -> vector<32x128xf32>
    %c0_3 = arith.constant 0 : index
    %c0_4 = arith.constant 0 : index
    %3 = vector.load %arg3[%c0_3, %c0_4] : memref<32x1xf32, #tpu.memory_space<vmem>>, vector<32x1xf32>
    %4 = vector.broadcast %3 : vector<32x1xf32> to vector<32x128xf32>
    %5 = arith.addf %2, %4 : vector<32x128xf32>
    %6 = math.tanh %5 : vector<32x128xf32>
    %c0_5 = arith.constant 0 : index
    %c0_6 = arith.constant 0 : index
    %7 = vector.load %arg4[%c0_5, %c0_6] : memref<32x32xf32, #tpu.memory_space<vmem>>, vector<32x32xf32>
    %cst_7 = arith.constant dense<0.000000e+00> : vector<32x128xf32>
    %8 = tpu.matmul %7, %6, %cst_7 {dimension_numbers = #tpu.dot_dimension_numbers<[1], [0], [0], [1], [0, 0, 1, 1], [], []>} : vector<32x32xf32>, vector<32x128xf32>, vector<32x128xf32> -> vector<32x128xf32>
    %c0_8 = arith.constant 0 : index
    %c0_9 = arith.constant 0 : index
    %9 = vector.load %arg5[%c0_8, %c0_9] : memref<32x1xf32, #tpu.memory_space<vmem>>, vector<32x1xf32>
    %10 = vector.broadcast %9 : vector<32x1xf32> to vector<32x128xf32>
    %11 = arith.addf %8, %10 : vector<32x128xf32>
    %12 = math.tanh %11 : vector<32x128xf32>
    %c0_10 = arith.constant 0 : index
    %c0_11 = arith.constant 0 : index
    %13 = vector.load %arg6[%c0_10, %c0_11] : memref<32x1xf32, #tpu.memory_space<vmem>>, vector<32x1xf32>
    %14 = vector.broadcast %13 : vector<32x1xf32> to vector<32x128xf32>
    %15 = arith.mulf %12, %14 : vector<32x128xf32>
    %cst_12 = arith.constant dense<0.000000e+00> : vector<128xf32>
    %16 = vector.multi_reduction <add>, %15, %cst_12 [0] : vector<32x128xf32> to vector<128xf32>
    %17 = vector.shape_cast %16 : vector<128xf32> to vector<1x128xf32>
    %c0_13 = arith.constant 0 : index
    %c0_14 = arith.constant 0 : index
    %18 = memref.load %arg7[%c0_13, %c0_14] : memref<1x1xf32, #tpu.memory_space<smem>>
    %19 = vector.broadcast %18 : f32 to vector<1x128xf32>
    %20 = arith.addf %17, %19 : vector<1x128xf32>
    %c0_15 = arith.constant 0 : index
    %c0_16 = arith.constant 0 : index
    %21 = vector.load %arg8[%c0_15, %c0_16] : memref<1x128xf32, #tpu.memory_space<vmem>>, vector<1x128xf32>
    tpu.vector_store %arg8[%c0_15, %c0_16], %20 {strides = array<i32>} : memref<1x128xf32, #tpu.memory_space<vmem>>, vector<1x128xf32>,
    return
  }
  func.func @transform_0(%arg0: i32) -> (i32, i32) {
    %c0_i32 = arith.constant 0 : i32
    %c0_i32_0 = arith.constant 0 : i32
    return %c0_i32, %arg0 : i32, i32
  }
  func.func @transform_1(%arg0: i32) -> (i32, i32) {
    %c0_i32 = arith.constant 0 : i32
    %c0_i32_0 = arith.constant 0 : i32
    %c0_i32_1 = arith.constant 0 : i32
    return %c0_i32, %c0_i32_0 : i32, i32
  }
  func.func @transform_2(%arg0: i32) -> (i32, i32) {
    %c0_i32 = arith.constant 0 : i32
    %c0_i32_0 = arith.constant 0 : i32
    %c0_i32_1 = arith.constant 0 : i32
    return %c0_i32, %c0_i32_0 : i32, i32
  }
  func.func @transform_3(%arg0: i32) -> (i32, i32) {
    %c0_i32 = arith.constant 0 : i32
    %c0_i32_0 = arith.constant 0 : i32
    %c0_i32_1 = arith.constant 0 : i32
    return %c0_i32, %c0_i32_0 : i32, i32
  }
  func.func @transform_4(%arg0: i32) -> (i32, i32) {
    %c0_i32 = arith.constant 0 : i32
    %c0_i32_0 = arith.constant 0 : i32
    %c0_i32_1 = arith.constant 0 : i32
    return %c0_i32, %c0_i32_0 : i32, i32
  }
  func.func @transform_5(%arg0: i32) -> (i32, i32) {
    %c0_i32 = arith.constant 0 : i32
    %c0_i32_0 = arith.constant 0 : i32
    %c0_i32_1 = arith.constant 0 : i32
    return %c0_i32, %c0_i32_0 : i32, i32
  }
  func.func @transform_6(%arg0: i32) -> (i32, i32) {
    %c0_i32 = arith.constant 0 : i32
    %c0_i32_0 = arith.constant 0 : i32
    %c0_i32_1 = arith.constant 0 : i32
    return %c0_i32, %c0_i32_0 : i32, i32
  }
  func.func @transform_7(%arg0: i32) -> (i32, i32) {
    %c0_i32 = arith.constant 0 : i32
    %c0_i32_0 = arith.constant 0 : i32
    return %c0_i32, %arg0 : i32, i32
  }
}

</mosaic_0001>

<bundles_post_ra>
// kernel: discriminator_forward.1
= control target key start
LH: loop header
LB: loop body
LE: loop exit
PB: predicated region body
PF: predicated region fallthrough
CT: control target
= control target key end

     0   :  { %vm56_vm0 = vcmask 64512   ;;  %v407_v3 = vmov 0   ;;  %vm186_vm1 = vcmask 261120   ;;  %s525_s0 = inlined_call_operand.vmem [shape: f32[8,128], index: 0, kind: input, shape index: {}]   ;;  %s526_s1 = inlined_call_operand.vmem [shape: f32[32,8], index: 1, kind: input, shape index: {}]   ;;  %s527_s2 = inlined_call_operand.vmem [shape: f32[32,1], index: 2, kind: input, shape index: {}]   ;;  %s528_s4 = inlined_call_operand.vmem [shape: f32[32,1], index: 4, kind: input, shape index: {}]   ;;  %s529_s5 = inlined_call_operand.vmem [shape: f32[32,1], index: 5, kind: input, shape index: {}]   ;;  %s530_s3 = inlined_call_operand.vmem [shape: f32[32,32], index: 3, kind: input, shape index: {}]   ;;  %s531_s6 = inlined_call_operand.<no memory space> [shape: f32[1,1], index: 6, kind: input, shape index: {}]   ;;  %s532_s7 = inlined_call_operand.vmem [shape: f32[1,128], index: 7, kind: output, shape index: {}]  }
   0x1   :  { %v27_v0 = vld [vmem:[%s525_s0] sm:$0xff]  ;;  %v29_v2 = vld [vmem:[%s526_s1 + $0x8] sm:$0xff]  ;;  %389 = vset.pattern.permute.xlu0 %v407_v3  ;;  %390 = vset.pattern.permute.xlu1 %v407_v3  ;;  %v30_v4 = vld [vmem:[%s526_s1 + $0x10] sm:$0xff] }
   0x2   :  { %v28_v1 = vld [vmem:[%s526_s1] sm:$0xff]  ;;  %354 = vmatprep.subr.mxu0 %v27_v0  ;;  %v34_v6 = vld [vmem:[%s527_s2 + $0x10] sm:$0xff]  ;;  %v33_v7 = vld [vmem:[%s527_s2 + $0x8] sm:$0xff] }
   0x3   :  { %356 = vmatprep.mubr.msk.f32.mxu0 %vm56_vm0, %v28_v1  ;;  %v32_v5 = vld [vmem:[%s527_s2] sm:$0xff]  ;;  %355 = vmatpush3.msra.mxu0 %v27_v0  ;;  %v31_v8 = vld [vmem:[%s526_s1 + $0x18] sm:$0xff]  ;;  %v163_v11 = vld [vmem:[%s528_s4 + $0x8] sm:$0xff] }
   0x4   :  { %38 = vperm.xlu0 %389, %v32_v5   ;;  %357 = vmatmul.mubr.msk.f32.vlgmr.msra.gmra.mrb[0].mxu0 %vm56_vm0, %v29_v2  ;;  %v35_v9 = vld [vmem:[%s527_s2 + $0x18] sm:$0xff]  ;;  %v162_v10 = vld [vmem:[%s528_s4] sm:$0xff]  ;;  %v164_v12 = vld [vmem:[%s528_s4 + $0x10] sm:$0xff] }
   0x5   :  { %48 = vperm.xlu1 %390, %v34_v6   ;;  %359 = vmatprep.mubr.msk.f32.mxu0 %vm56_vm0, %v30_v4  ;;  %v165_v13 = vld [vmem:[%s528_s4 + $0x18] sm:$0xff]  ;;  %v288_v14 = vld [vmem:[%s529_s5] sm:$0xff]  ;;  %v289_v15 = vld [vmem:[%s529_s5 + $0x8] sm:$0xff] }
   0x6   :  { %v290_v16 = vld [vmem:[%s529_s5 + $0x10] sm:$0xff]  ;;  %v291_v17 = vld [vmem:[%s529_s5 + $0x18] sm:$0xff]  ;;  %v158_v18 = vld [vmem:[%s530_s3] sm:$0xff] }
   0x7   :  { %v160_v19 = vld [vmem:[%s530_s3 + $0x10] sm:$0xff]  ;;  %v159_v38 = vld [vmem:[%s530_s3 + $0x8] sm:$0xff]  ;;  %v161_v39 = vld [vmem:[%s530_s3 + $0x18] sm:$0xff] }
   0x8   :  { %43 = vperm.xlu0 %389, %v33_v7   ;;  %360 = vmatmul.mubr.msk.f32.gmra.mrb[2].mxu0 %vm56_vm0, %v31_v8  ;;  %v326_v8 = vstv %s531_s6 }
   0x9   :  { %53 = vperm.xlu1 %390, %v35_v9   ;;  %370 = vmatprep.mubr.msk.f32.mxu0 %vm186_vm1, %v158_v18 }
   0xa   :  { %373 = vmatprep.mubr.msk.f32.mxu1 %vm186_vm1, %v160_v19 }
   0xc   :  { %168 = vperm.xlu0 %389, %v162_v10  }
   0xd   :  { %173 = vperm.xlu1 %390, %v163_v11  }
  0x10   :  { %178 = vperm.xlu0 %389, %v164_v12  }
  0x11   :  { %183 = vperm.xlu1 %390, %v165_v13  }
  0x14   :  { %294 = vperm.xlu0 %389, %v288_v14  }
  0x15   :  { %299 = vperm.xlu1 %390, %v289_v15  }
  0x18   :  { %304 = vperm.xlu0 %389, %v290_v16  }
  0x19   :  { %309 = vperm.xlu1 %390, %v291_v17  }
  0x83   :  { %v39_v20 = vpop.permute.xlu0 %38 }
  0x84   :  { %v49_v21 = vpop.permute.xlu1 %48 }
  0x87   :  { %v44_v22 = vpop.permute.xlu0 %43 }
  0x88   :  { %v54_v27 = vpop.permute.xlu1 %53 }
  0x8b   :  { %v169_v40 = vpop.permute.xlu0 %168 }
  0x8c   :  { %v174_v41 = vpop.permute.xlu1 %173 }
  0x8f   :  { %v179_v42 = vpop.permute.xlu0 %178 }
  0x90   :  { %v184_v48 = vpop.permute.xlu1 %183 }
  0x93   :  { %v295_v52 = vpop.permute.xlu0 %294 }
  0x94   :  { %v300_v54 = vpop.permute.xlu1 %299 }
  0x97   :  { %v305_v60 = vpop.permute.xlu0 %304 }
  0x98   :  { %v310_v63 = vpop.permute.xlu1 %309 }
  0xd7   :  { %v358_v23 = vpop.f32.mrb[0].mxu0 }
  0xd8   :  { %v141_v24 = vadd.f32 %v358_v23, %v44_v22  ;;  %v135_v25 = vpop.f32.mrb[1].mxu0 }
  0xd9   :  { %v136_v26 = vadd.f32 %v135_v25, %v39_v20 }
  0xda   :  { %391 = vtanh.f32 %v141_v24 }
  0xdb   :  { %393 = vtanh.f32 %v136_v26  ;;  %v361_v28 = vpop.f32.mrb[2].mxu0 }
  0xdc   :  { %v151_v29 = vadd.f32 %v361_v28, %v54_v27  ;;  %v145_v30 = vpop.f32.mrb[3].mxu0 }
  0xdd   :  { %v146_v31 = vadd.f32 %v145_v30, %v49_v21 }
  0xde   :  { %395 = vtanh.f32 %v151_v29 }
  0xdf   :  { %397 = vtanh.f32 %v146_v31 }
  0xe4   :  { %v392_v32 = vpop.eup %391 }
  0xe5   :  { %v394_v33 = vpop.eup %393 }
  0xe6   :  { %v376_v34 = vpack.c.bf16 %v392_v32, %v394_v33 }
  0xe8   :  { %v396_v35 = vpop.eup %395  ;;  %377 = vmatprep.subr.bf16.mxu0 %v376_v34  ;;  %384 = vmatprep.subr.bf16.mxu1 %v376_v34 }
  0xe9   :  { %v398_v36 = vpop.eup %397  ;;  %379 = vmatpush3.bf16.msra.mxu0 %v376_v34  ;;  %386 = vmatpush3.bf16.msra.mxu1 %v376_v34 }
  0xea   :  { %v380_v37 = vpack.c.bf16 %v396_v35, %v398_v36 }
  0xec   :  { %381 = vmatprep.subr.bf16.mxu0 %v380_v37  ;;  %385 = vmatprep.subr.bf16.mxu1 %v380_v37 }
  0xed   :  { %383 = vmatpush3.bf16.msra.mxu0 %v380_v37  ;;  %387 = vmatpush3.bf16.msra.mxu1 %v380_v37 }
  0xf0   :  { %371 = vmatmul.mubr.msk.f32.vlgmr.msra.gmra.mrb[4].mxu0 %vm186_vm1, %v159_v38  ;;  %374 = vmatmul.mubr.msk.f32.vlgmr.msra.gmra.mrb[0].mxu1 %vm186_vm1, %v161_v39 }
 0x1c3   :  { %v372_v43 = vpop.f32.mrb[4].mxu0  ;;  %v375_v44 = vpop.f32.mrb[0].mxu1 }
 0x1c4   :  { %v271_v45 = vadd.f32 %v372_v43, %v174_v41  ;;  %v265_v46 = vpop.f32.mrb[5].mxu0  ;;  %v275_v47 = vpop.f32.mrb[1].mxu1  ;;  %v281_v51 = vadd.f32 %v375_v44, %v184_v48 }
 0x1c5   :  { %v266_v49 = vadd.f32 %v265_v46, %v169_v40  ;;  %v276_v50 = vadd.f32 %v275_v47, %v179_v42 }
 0x1c6   :  { %399 = vtanh.f32 %v271_v45 }
 0x1c7   :  { %401 = vtanh.f32 %v266_v49 }
 0x1c8   :  { %403 = vtanh.f32 %v276_v50 }
 0x1c9   :  { %405 = vtanh.f32 %v281_v51 }
 0x1d0   :  { %v400_v53 = vpop.eup %399 }
 0x1d1   :  { %v313_v55 = vmul.f32 %v400_v53, %v300_v54  ;;  %v402_v56 = vpop.eup %401 }
 0x1d2   :  { %v404_v57 = vpop.eup %403  ;;  %v312_v58 = vmul.f32 %v402_v56, %v295_v52 }
 0x1d3   :  { %v406_v59 = vpop.eup %405  ;;  %v314_v62 = vmul.f32 %v404_v57, %v305_v60 }
 0x1d4   :  { %v316_v61 = vadd.f32 %v313_v55, %v312_v58  ;;  %v315_v0 = vmul.f32 %v406_v59, %v310_v63 }
 0x1d6   :  { %v317_v1 = vadd.f32 %v316_v61, %v314_v62 }
 0x1d8   :  { %v318_v2 = vadd.f32 %v317_v1, %v315_v0 }
 0x1da   :  { %v319_v3 = vrot.slane %v318_v2, 4 }
 0x1dc   :  { %v320_v4 = vadd.f32 %v319_v3, %v318_v2 }
 0x1de   :  { %v321_v5 = vrot.slane %v320_v4, 2 }
 0x1e0   :  { %v322_v6 = vadd.f32 %v321_v5, %v320_v4 }
 0x1e2   :  { %v323_v7 = vrot.slane %v322_v6, 1 }
 0x1e4   :  { %v324_v9 = vadd.f32 %v323_v7, %v322_v6 }
 0x1e6   :  { %v327_v10 = vadd.f32 %v326_v8, %v324_v9 }
 0x1e8   :  { %328 = vst [vmem:[%s532_s7] sm:$0x1] %v327_v10 }

</bundles_post_ra>
